<compile_context>
chip_gen: v7x
topology: tpu7x:2x2x1
jax: 0.10.0
libtpu: 0.0.40
codegen_flags: <defaults>
</compile_context>

<pallas_src>
import functools

import jax
import jax.numpy as jnp
from jax.experimental import pallas as pl
from jax.experimental.pallas import tpu as pltpu


def _round_up(n, m):
    return ((n + m - 1) // m) * m


# --------------------------------------------------------------------------- #
# Kernel
# --------------------------------------------------------------------------- #
def residual_block_kernel(x_ref, w1_ref, b1_ref, w2_ref, b2_ref, o_ref, acc_ref,
                          *, bf16_tanh):
    """out = tanh(fc2(tanh(fc1(x))) + x), accumulated over hidden-feature tiles."""
    j = pl.program_id(1)

    @pl.when(j == 0)
    def _init():
        acc_ref[...] = jnp.zeros_like(acc_ref)

    x = x_ref[...]                                        # (tb, Dp), input dtype (f32)

    # fc1 column-tile j: MXU dot with f32 accumulation, bias add in f32.
    h = jnp.dot(x.astype(w1_ref.dtype), w1_ref[...],
                preferred_element_type=jnp.float32) + b1_ref[...]
    if bf16_tanh:
        h = jnp.tanh(h.astype(jnp.bfloat16))              # bf16 EUP (v6e / v7x)
    else:
        h = jnp.tanh(h).astype(w2_ref.dtype)              # f32 EUP (v5e / f32 path)

    # fc2 K-tile j: accumulate partial product into the f32 scratch.
    acc_ref[...] += jnp.dot(h, w2_ref[...], preferred_element_type=jnp.float32)

    @pl.when(j == pl.num_programs(1) - 1)
    def _finalize():
        # bias + exact-f32 residual + final tanh, then cast to the output dtype.
        out = acc_ref[...] + b2_ref[...] + x.astype(jnp.float32)
        o_ref[...] = jnp.tanh(out).astype(o_ref.dtype)


# --------------------------------------------------------------------------- #
# Host-side helpers
# --------------------------------------------------------------------------- #
def _vmem_capacity_bytes():
    """Physical VMEM per TensorCore; conservative 64 MiB (v7x) fallback."""
    try:
        info = pltpu.get_tpu_info()
        cap = int(getattr(info, "vmem_capacity_bytes", 0))
        if cap > 0:
            return cap
    except Exception:
        pass
    return 64 * 1024 * 1024


def _bf16_tanh_supported():
    """bf16 EUP/VPU exists on v6e / v7x; keep f32 tanh elsewhere."""
    try:
        kind = jax.devices()[0].device_kind.lower()
    except Exception:
        return False
    return any(tag in kind for tag in ("v6", "v7"))


def _pad_to(a, shape, dtype):
    if tuple(a.shape) == tuple(shape) and a.dtype == jnp.dtype(dtype):
        return a
    out = jnp.zeros(shape, dtype)
    return out.at[tuple(slice(0, s) for s in a.shape)].set(a.astype(dtype))


def _build_call(kernel, tb, th, Dp, Hp, Bp, out_dtype, vmem_limit):
    grid = (Bp // tb, Hp // th)
    return pl.pallas_call(
        kernel,
        out_shape=jax.ShapeDtypeStruct((Bp, Hp), out_dtype),
        grid_spec=pltpu.PrefetchScalarGridSpec(
            num_scalar_prefetch=0,
            grid=grid,
            in_specs=[
                pl.BlockSpec((tb, Dp), lambda i, j: (i, 0)),   # x tile (held across j)
                pl.BlockSpec((Dp, th), lambda i, j: (0, j)),   # w1 column tile
                pl.BlockSpec((1, th), lambda i, j: (0, j)),    # b1 tile (f32)
                pl.BlockSpec((th, Hp), lambda i, j: (j, 0)),   # w2 row (K) tile
                pl.BlockSpec((1, Hp), lambda i, j: (0, 0)),    # b2 (f32)
            ],
            out_specs=pl.BlockSpec((tb, Hp), lambda i, j: (i, 0)),  # lane-dense out
            scratch_shapes=[pltpu.VMEM((tb, Hp), jnp.float32)],     # fc2 accumulator
        ),
        compiler_params=pltpu.CompilerParams(
            dimension_semantics=("parallel", "arbitrary"),
            vmem_limit_bytes=vmem_limit,
        ),
    )


# --------------------------------------------------------------------------- #
# Public wrapper
# --------------------------------------------------------------------------- #
def residual_block(x, w1, b1, w2, b2, *, block_batch=1024, compute_dtype=jnp.bfloat16):
    """x: (B, D). w1: (D, H), b1: (H,), w2: (H, H), b2: (H,). Returns (B, H) in x.dtype.

    compute_dtype: dtype of the weights / MXU operands (default bf16 on all TPU
    generations; accumulation, bias, residual and final tanh stay in f32).
    """
    B, D = x.shape
    H = w1.shape[1]
    assert D == H, "ResidualBlock requires input_size == output_size for the residual add"

    out_dtype = x.dtype
    in_dtype = x.dtype                       # x stays in its HBM dtype -> exact residual
    compute_dtype = jnp.dtype(compute_dtype)

    # Lane-dense features: pad D == H up to a multiple of 128.
    Dp = Hp = max(128, _round_up(D, 128))

    # --- batch tile: large for HBM-bound v5e, but >=2 grid steps for v7x megacore ---
    bb = max(128, _round_up(block_batch, 128))
    if B > bb:
        tb0 = bb
    elif B >= 256:
        tb0 = _round_up(-(-B // 2), 128)     # split medium batches across >=2 steps
    else:
        tb0 = _round_up(B, 8)

    # --- VMEM budgeting: include scratch + in-kernel f32 intermediates -------------
    vmem_cap = _vmem_capacity_bytes()
    budget = int(0.80 * vmem_cap)

    isz_c = compute_dtype.itemsize
    isz_x = jnp.dtype(in_dtype).itemsize
    isz_o = jnp.dtype(out_dtype).itemsize

    def footprint(tb_, th_):
        f = 2 * tb_ * Dp * isz_x             # x tile, double-buffered
        f += 2 * tb_ * Hp * isz_o            # out tile, double-buffered
        f += 2 * Dp * th_ * isz_c            # w1 tile, double-buffered
        f += 2 * th_ * Hp * isz_c            # w2 tile, double-buffered
        f += 2 * 8 * (th_ + Hp) * 4          # biases (sublane-padded)
        f += tb_ * Hp * 4                    # fc2 accumulator scratch (f32)
        f += tb_ * th_ * 4 + tb_ * Hp * 4    # in-kernel f32 intermediates (h, fc2 tmp)
        return f

    # Batch-tile candidates (halving), feature-tile candidates (divisors of Hp, x128).
    tb_list = []
    t = tb0
    while t >= 8:
        tb_list.append(t)
        if t == 8:
            break
        t = max(8, _round_up(t // 2, 8))
    th_candidates = sorted(
        {Hp // k for k in range(1, Hp // 128 + 1)
         if Hp % k == 0 and (Hp // k) % 128 == 0},
        reverse=True)

    # Prefer resident weights with a decent batch tile; otherwise tile the weights
    # (feature-axis grid) before collapsing the batch tile to tiny sizes.
    config = None
    for tb_floor in (min(tb0, 256), 8):
        for th_try in th_candidates:
            for tb_try in tb_list:
                if tb_try < tb_floor:
                    break
                if footprint(tb_try, th_try) <= budget:
                    config = (tb_try, th_try)
                    break
            if config:
                break
        if config:
            break
    if config is None:                       # best effort: smallest tiles
        config = (tb_list[-1], th_candidates[-1])
    tb, th = config

    Bp = _round_up(B, tb)

    need = footprint(tb, th)
    vmem_limit = min(max(32 * 1024 * 1024, int(need * 1.3)),
                     int(0.90 * vmem_cap))

    # --- pad / cast operands --------------------------------------------------------
    x_p = _pad_to(x, (Bp, Dp), in_dtype)
    w1_p = _pad_to(w1, (Dp, Hp), compute_dtype)
    w2_p = _pad_to(w2, (Hp, Hp), compute_dtype)
    b1_p = _pad_to(b1.reshape(1, H), (1, Hp), jnp.float32)
    b2_p = _pad_to(b2.reshape(1, H), (1, Hp), jnp.float32)

    bf16_tanh = (compute_dtype == jnp.bfloat16) and _bf16_tanh_supported()
    kernel = functools.partial(residual_block_kernel, bf16_tanh=bf16_tanh)

    out_p = _build_call(kernel, tb, th, Dp, Hp, Bp, out_dtype, vmem_limit)(
        x_p, w1_p, b1_p, w2_p, b2_p)

    return out_p[:B, :H]


# --------------------------------------------------------------------------- #
# Init (matches torch.nn.init.normal_(..., std=0.1) in the module) & reference
# --------------------------------------------------------------------------- #
def init_params(key, input_size, output_size, std=0.1):
    k1, k2, k3, k4 = jax.random.split(key, 4)
    # PyTorch stores Linear weight as (out, in); we build (in, out) directly so the
    # kernel computes x @ W without a transpose.
    w1 = std * jax.random.normal(k1, (input_size, output_size), jnp.float32)
    b1 = std * jax.random.normal(k2, (output_size,), jnp.float32)
    w2 = std * jax.random.normal(k3, (output_size, output_size), jnp.float32)
    b2 = std * jax.random.normal(k4, (output_size,), jnp.float32)
    return w1, b1, w2, b2


def residual_block_ref(x, w1, b1, w2, b2):
    """Pure-JAX reference of the PyTorch forward."""
    h = jnp.tanh(x @ w1 + b1)
    return jnp.tanh(h @ w2 + b2 + x)


if __name__ == "__main__":
    key = jax.random.PRNGKey(0)
    kx, kp = jax.random.split(key)

    batch = 8
    input_size = output_size = 32   # residual add implies input_size == output_size

    x = jax.random.normal(kx, (batch, input_size), jnp.float32)
    w1, b1, w2, b2 = init_params(kp, input_size, output_size)

    ref = residual_block_ref(x, w1, b1, w2, b2)

    # f32 compute path — tight check vs pure-JAX reference.
    out_f32 = jax.block_until_ready(
        residual_block(x, w1, b1, w2, b2, compute_dtype=jnp.float32))
    assert out_f32.shape == (batch, output_size)
    assert jnp.allclose(out_f32, ref, atol=1e-5, rtol=1e-5), "f32 kernel mismatch vs reference"

    # Default path: bf16 MXU, f32 accumulation + exact f32 residual / final tanh.
    out = jax.block_until_ready(residual_block(x, w1, b1, w2, b2))
    assert out.shape == (batch, output_size)
    assert jnp.allclose(out, ref, atol=5e-2, rtol=5e-2), "bf16 kernel mismatch vs reference"

    print("KERNEL_OK")
</pallas_src>

<mosaic_0001>
module attributes {stable_mosaic.version = 11 : i64} {
  func.func @residual_block_kernel(%arg0: i32, %arg1: i32, %arg2: memref<8x128xf32, #tpu.memory_space<vmem>>, %arg3: memref<128x128xf32, #tpu.memory_space<vmem>>, %arg4: memref<1x128xf32, #tpu.memory_space<vmem>>, %arg5: memref<128x128xf32, #tpu.memory_space<vmem>>, %arg6: memref<1x128xf32, #tpu.memory_space<vmem>>, %arg7: memref<8x128xf32, #tpu.memory_space<vmem>>, %arg8: memref<8x128xf32, #tpu.memory_space<vmem>>) attributes {dimension_semantics = [#tpu.dimension_semantics<parallel>, #tpu.dimension_semantics<arbitrary>], iteration_bounds = array<i64: 1, 1>, scalar_prefetch = 0 : i64, scratch_operands = 1 : i64, tpu.core_type = #tpu.core_type<tc>, window_params = [{transform_indices = @transform_0, window_bounds = array<i64: 8, 128>}, {transform_indices = @transform_1, window_bounds = array<i64: 128, 128>}, {transform_indices = @transform_2, window_bounds = array<i64: 1, 128>}, {transform_indices = @transform_3, window_bounds = array<i64: 128, 128>}, {pipeline_mode = #tpu.pipeline_mode<synchronous>, transform_indices = @transform_4, window_bounds = array<i64: 1, 128>}, {transform_indices = @transform_5, window_bounds = array<i64: 8, 128>}]} {
    %c0_i32 = arith.constant 0 : i32
    %0 = arith.cmpi eq, %arg1, %c0_i32 : i32
    %1 = arith.extui %0 : i1 to i32
    %c0_i32_0 = arith.constant 0 : i32
    %2 = arith.cmpi ne, %1, %c0_i32_0 : i32
    scf.if %2 {
      %cst_15 = arith.constant 0.000000e+00 : f32
      %18 = vector.broadcast %cst_15 : f32 to vector<8x128xf32>
      %c0_16 = arith.constant 0 : index
      %c0_17 = arith.constant 0 : index
      %19 = vector.load %arg8[%c0_16, %c0_17] : memref<8x128xf32, #tpu.memory_space<vmem>>, vector<8x128xf32>
      tpu.vector_store %arg8[%c0_16, %c0_17], %18 {strides = array<i32>} : memref<8x128xf32, #tpu.memory_space<vmem>>, vector<8x128xf32>,
    } else {
    }
    %c0 = arith.constant 0 : index
    %c0_1 = arith.constant 0 : index
    %3 = vector.load %arg2[%c0, %c0_1] : memref<8x128xf32, #tpu.memory_space<vmem>>, vector<8x128xf32>
    %c0_2 = arith.constant 0 : index
    %c0_3 = arith.constant 0 : index
    %4 = vector.load %arg3[%c0_2, %c0_3] : memref<128x128xf32, #tpu.memory_space<vmem>>, vector<128x128xf32>
    %cst = arith.constant dense<0.000000e+00> : vector<8x128xf32>
    %5 = tpu.matmul %3, %4, %cst {dimension_numbers = #tpu.dot_dimension_numbers<[1], [0], [0], [1], [0, 0, 1, 1], [], []>} : vector<8x128xf32>, vector<128x128xf32>, vector<8x128xf32> -> vector<8x128xf32>
    %c0_4 = arith.constant 0 : index
    %c0_5 = arith.constant 0 : index
    %6 = vector.load %arg4[%c0_4, %c0_5] : memref<1x128xf32, #tpu.memory_space<vmem>>, vector<1x128xf32>
    %7 = vector.broadcast %6 : vector<1x128xf32> to vector<8x128xf32>
    %8 = arith.addf %5, %7 : vector<8x128xf32>
    %9 = math.tanh %8 : vector<8x128xf32>
    %c0_6 = arith.constant 0 : index
    %c0_7 = arith.constant 0 : index
    %10 = vector.load %arg8[%c0_6, %c0_7] : memref<8x128xf32, #tpu.memory_space<vmem>>, vector<8x128xf32>
    %c0_8 = arith.constant 0 : index
    %c0_9 = arith.constant 0 : index
    %11 = vector.load %arg5[%c0_8, %c0_9] : memref<128x128xf32, #tpu.memory_space<vmem>>, vector<128x128xf32>
    %cst_10 = arith.constant dense<0.000000e+00> : vector<8x128xf32>
    %12 = tpu.matmul %9, %11, %cst_10 {dimension_numbers = #tpu.dot_dimension_numbers<[1], [0], [0], [1], [0, 0, 1, 1], [], []>} : vector<8x128xf32>, vector<128x128xf32>, vector<8x128xf32> -> vector<8x128xf32>
    %13 = arith.addf %10, %12 : vector<8x128xf32>
    %c0_11 = arith.constant 0 : index
    %c0_12 = arith.constant 0 : index
    %14 = vector.load %arg8[%c0_11, %c0_12] : memref<8x128xf32, #tpu.memory_space<vmem>>, vector<8x128xf32>
    tpu.vector_store %arg8[%c0_11, %c0_12], %13 {strides = array<i32>} : memref<8x128xf32, #tpu.memory_space<vmem>>, vector<8x128xf32>,
    %c0_i32_13 = arith.constant 0 : i32
    %15 = arith.cmpi eq, %arg1, %c0_i32_13 : i32
    %16 = arith.extui %15 : i1 to i32
    %c0_i32_14 = arith.constant 0 : i32
    %17 = arith.cmpi ne, %16, %c0_i32_14 : i32
    scf.if %17 {
      %c0_15 = arith.constant 0 : index
      %c0_16 = arith.constant 0 : index
      %18 = vector.load %arg8[%c0_15, %c0_16] : memref<8x128xf32, #tpu.memory_space<vmem>>, vector<8x128xf32>
      %c0_17 = arith.constant 0 : index
      %c0_18 = arith.constant 0 : index
      %19 = vector.load %arg6[%c0_17, %c0_18] : memref<1x128xf32, #tpu.memory_space<vmem>>, vector<1x128xf32>
      %20 = vector.broadcast %19 : vector<1x128xf32> to vector<8x128xf32>
      %21 = arith.addf %18, %20 : vector<8x128xf32>
      %22 = arith.addf %21, %3 : vector<8x128xf32>
      %23 = math.tanh %22 : vector<8x128xf32>
      %c0_19 = arith.constant 0 : index
      %c0_20 = arith.constant 0 : index
      %24 = vector.load %arg7[%c0_19, %c0_20] : memref<8x128xf32, #tpu.memory_space<vmem>>, vector<8x128xf32>
      tpu.vector_store %arg7[%c0_19, %c0_20], %23 {strides = array<i32>} : memref<8x128xf32, #tpu.memory_space<vmem>>, vector<8x128xf32>,
    } else {
    }
    return
  }
  func.func @transform_0(%arg0: i32, %arg1: i32) -> (i32, i32) {
    %c0_i32 = arith.constant 0 : i32
    %c0_i32_0 = arith.constant 0 : i32
    return %arg0, %c0_i32 : i32, i32
  }
  func.func @transform_1(%arg0: i32, %arg1: i32) -> (i32, i32) {
    %c0_i32 = arith.constant 0 : i32
    %c0_i32_0 = arith.constant 0 : i32
    return %c0_i32, %arg1 : i32, i32
  }
  func.func @transform_2(%arg0: i32, %arg1: i32) -> (i32, i32) {
    %c0_i32 = arith.constant 0 : i32
    %c0_i32_0 = arith.constant 0 : i32
    return %c0_i32, %arg1 : i32, i32
  }
  func.func @transform_3(%arg0: i32, %arg1: i32) -> (i32, i32) {
    %c0_i32 = arith.constant 0 : i32
    %c0_i32_0 = arith.constant 0 : i32
    return %arg1, %c0_i32 : i32, i32
  }
  func.func @transform_4(%arg0: i32, %arg1: i32) -> (i32, i32) {
    %c0_i32 = arith.constant 0 : i32
    %c0_i32_0 = arith.constant 0 : i32
    %c0_i32_1 = arith.constant 0 : i32
    return %c0_i32, %c0_i32_0 : i32, i32
  }
  func.func @transform_5(%arg0: i32, %arg1: i32) -> (i32, i32) {
    %c0_i32 = arith.constant 0 : i32
    %c0_i32_0 = arith.constant 0 : i32
    return %arg0, %c0_i32 : i32, i32
  }
}

</mosaic_0001>

<bundles_post_ra>
// kernel: tpu_custom_call.1
= control target key start
LH: loop header
LB: loop body
LE: loop exit
PB: predicated region body
PF: predicated region fallthrough
CT: control target
= control target key end

     0   :  { %10 = vsyncpa [#allocation4], 0  ;;  %s656_s0 = inlined_call_operand.hbm [shape: f32[8,128], index: 0, kind: input, shape index: {}]   ;;  %s657_s1 = inlined_call_operand.hbm [shape: f32[128,128], index: 1, kind: input, shape index: {}]   ;;  %s658_s2 = inlined_call_operand.vmem [shape: f32[1,128], index: 2, kind: input, shape index: {}]   ;;  %s659_s3 = inlined_call_operand.hbm [shape: f32[128,128], index: 3, kind: input, shape index: {}]   ;;  %s660_s4 = inlined_call_operand.vmem [shape: f32[1,128], index: 4, kind: input, shape index: {}]   ;;  %s661_s5 = inlined_call_operand.hbm [shape: f32[8,128], index: 5, kind: output, shape index: {}]  }
   0x1   :  { %11 = vsyncpa [#allocation7], 0 }
   0x2   :  { %12 = vsyncpa [#allocation5], 0  ;;  %s541_s18 = smov [#allocation6]   ;;  %s447_s22 = scalar_lea.hbm %s657_s1, 2048 }
   0x3   :  { %s28_s19 = sshll.u32 %s541_s18, 4  ;;  %p448_p0 = scmp.ne.s32.totalorder %s657_s1, %s447_s22  ;;  %s29_s19 = int_to_ptr.vmem [resolvable:$true] %s28_s19 }
   0x4   :  { %p451_p1 = scmp.lt.u32.totalorder %s447_s22, %s657_s1 }
   0x6   :  { %p453_p2 = pnand %p451_p1, %p448_p0 }
   0x8   :  { %456 = shalt.err (!%p453_p2)
}
   0x9   :  { %s457_s27 = scalar_lea.vmem %s29_s19, 2048  ;;  %p462_p4 = scmp.lt.s32.totalorder %s29_s19, %s29_s19 }
   0xa   :  { %p458_p3 = scmp.ne.s32.totalorder %s29_s19, %s457_s27  ;;  %p463_p5 = scmp.lt.s32.totalorder %s457_s27, %s457_s27 }
   0xc   :  { %p464_p6 = por %p463_p5, %p462_p4 }
   0xe   :  { %p465_p7 = pnand %p464_p6, %p458_p3 }
  0x10   :  { %468 = shalt.err (!%p465_p7)
}
  0x11   :  { %s542_s28 = smov 128   ;;  %s543_s29 = smov 8  }
  0x12   :  { %34 = dma.hbm_to_vmem [thread:$0]  %s657_s1, 2048, %s29_s19, [#allocation7], %s542_s28, %s542_s28, %s543_s29  }
  0x13   :  { %s544_s7 = smov [#allocation3]   ;;  %s545_s9 = smov [#allocation8]  }
  0x14   :  { %s19_s8 = sshll.u32 %s544_s7, 4  ;;  %s42_s10 = sshll.u32 %s545_s9, 4  ;;  %s20_s8 = int_to_ptr.vmem [resolvable:$true] %s19_s8  ;;  %s43_s10 = int_to_ptr.vmem [resolvable:$true] %s42_s10 }
  0x15   :  { %s469_s13 = scalar_lea.hbm %s656_s0, 128 }
  0x16   :  { %p470_p8 = scmp.ne.s32.totalorder %s656_s0, %s469_s13  ;;  %p473_p9 = scmp.lt.u32.totalorder %s469_s13, %s656_s0 }
  0x18   :  { %p475_p10 = pnand %p473_p9, %p470_p8 }
  0x1a   :  { %478 = shalt.err (!%p475_p10)
}
  0x1b   :  { %s479_s1 = scalar_lea.vmem %s20_s8, 128  ;;  %p484_p12 = scmp.lt.s32.totalorder %s20_s8, %s20_s8 }
  0x1c   :  { %p480_p11 = scmp.ne.s32.totalorder %s20_s8, %s479_s1  ;;  %p485_p13 = scmp.lt.s32.totalorder %s479_s1, %s479_s1 }
  0x1e   :  { %p486_p0 = por %p485_p13, %p484_p12 }
  0x20   :  { %p487_p1 = pnand %p486_p0, %p480_p11 }
  0x22   :  { %490 = shalt.err (!%p487_p1)
}
  0x23   :  { %22 = dma.hbm_to_vmem [thread:$0]  %s656_s0, 128, %s20_s8, [#allocation4]  }
  0x24   :  { %s491_s22 = scalar_lea.hbm %s659_s3, 2048 }
  0x25   :  { %p492_p2 = scmp.ne.s32.totalorder %s659_s3, %s491_s22  ;;  %p495_p3 = scmp.lt.u32.totalorder %s491_s22, %s659_s3 }
  0x27   :  { %p497_p4 = pnand %p495_p3, %p492_p2 }
  0x29   :  { %500 = shalt.err (!%p497_p4)
}
  0x2a   :  { %s501_s27 = scalar_lea.vmem %s43_s10, 2048  ;;  %p506_p6 = scmp.lt.s32.totalorder %s43_s10, %s43_s10 }
  0x2b   :  { %p502_p5 = scmp.ne.s32.totalorder %s43_s10, %s501_s27  ;;  %p507_p7 = scmp.lt.s32.totalorder %s501_s27, %s501_s27 }
  0x2d   :  { %p508_p8 = por %p507_p7, %p506_p6 }
  0x2f   :  { %p509_p9 = pnand %p508_p8, %p502_p5 }
  0x31   :  { %512 = shalt.err (!%p509_p9)
}
  0x32   :  { %48 = dma.hbm_to_vmem [thread:$0]  %s659_s3, 2048, %s43_s10, [#allocation7], %s542_s28, %s542_s28, %s543_s29  }
  0x33   :  { %535 = dma.done.wait [#allocation4], 128  }
  0x34   :  { %536 = vsyncadd [#allocation4], 4294967168 }
  0x35   :  { %537 = dma.done.wait [#allocation7], 4096  }
  0x36   :  { %538 = vsyncadd [#allocation7], 4294963200  ;;  %v546_v0 = vmov 0.0|0.0   ;;  %vm547_vm0 = vmmov 0   ;;  %v548_v1 = vmov 0.0   ;;  %v66_v2 = vld [vmem:[#allocation6] sm:$0xff] }
  0x37   :  { %386 = vmatprep.subr.bf16.mxu0 %v546_v0  ;;  %348 = vmatprep.mubr.msk.f32.mxu0 %vm547_vm0, %v548_v1  ;;  %v67_v3 = vld [vmem:[#allocation6 + $0x8] sm:$0xff]  ;;  %v68_v4 = vld [vmem:[#allocation6 + $0x10] sm:$0xff]  ;;  %v69_v6 = vld [vmem:[#allocation6 + $0x18] sm:$0xff]  ;;  %s549_s7 = smov [#allocation9]  }
  0x38   :  { %410 = vmatprep.subr.bf16.mxu1 %v546_v0  ;;  %383 = vmatprep.mubr.msk.f32.mxu1 %vm547_vm0, %v548_v1  ;;  %v387_v5 = vpack.c.bf16 %v67_v3, %v66_v2  ;;  %v390_v7 = vpack.c.bf16 %v69_v6, %v68_v4  ;;  %v70_v8 = vld [vmem:[#allocation6 + $0x20] sm:$0xff]  ;;  %v71_v9 = vld [vmem:[#allocation6 + $0x28] sm:$0xff]  ;;  %v163_v12 = vld [vmem:[#allocation8 + $0x10] sm:$0xff]  ;;  %s270_s8 = sshll.u32 %s549_s7, 4  ;;  %s271_s8 = int_to_ptr.vmem [resolvable:$true] %s270_s8 }
  0x39   :  { %v161_v10 = vld [vmem:[#allocation8] sm:$0xff]  ;;  %v162_v11 = vld [vmem:[#allocation8 + $0x8] sm:$0xff]  ;;  %v164_v13 = vld [vmem:[#allocation8 + $0x18] sm:$0xff]  ;;  %v393_v14 = vpack.c.bf16 %v71_v9, %v70_v8  ;;  %p518_p11 = scmp.lt.s32.totalorder %s271_s8, %s271_s8 }
  0x3a   :  { %388 = vmatpush3.bf16.msra.mxu0 %v387_v5  ;;  %v411_v15 = vpack.c.bf16 %v162_v11, %v161_v10  ;;  %v72_v16 = vld [vmem:[#allocation6 + $0x30] sm:$0xff]  ;;  %v73_v17 = vld [vmem:[#allocation6 + $0x38] sm:$0xff]  ;;  %v414_v18 = vpack.c.bf16 %v164_v13, %v163_v12  ;;  %v165_v19 = vld [vmem:[#allocation8 + $0x20] sm:$0xff] }
  0x3b   :  { %389 = vmatprep.subr.bf16.mxu0 %v546_v0  ;;  %v166_v20 = vld [vmem:[#allocation8 + $0x28] sm:$0xff]  ;;  %v396_v21 = vpack.c.bf16 %v73_v17, %v72_v16  ;;  %v74_v22 = vld [vmem:[#allocation6 + $0x40] sm:$0xff]  ;;  %v167_v25 = vld [vmem:[#allocation8 + $0x30] sm:$0xff] }
  0x3c   :  { %412 = vmatpush3.bf16.msra.mxu1 %v411_v15  ;;  %v75_v23 = vld [vmem:[#allocation6 + $0x48] sm:$0xff]  ;;  %v417_v24 = vpack.c.bf16 %v166_v20, %v165_v19  ;;  %v168_v26 = vld [vmem:[#allocation8 + $0x38] sm:$0xff]  ;;  %v76_v28 = vld [vmem:[#allocation6 + $0x50] sm:$0xff] }
  0x3d   :  { %413 = vmatprep.subr.bf16.mxu1 %v546_v0  ;;  %v399_v27 = vpack.c.bf16 %v75_v23, %v74_v22  ;;  %v77_v29 = vld [vmem:[#allocation6 + $0x58] sm:$0xff]  ;;  %v420_v30 = vpack.c.bf16 %v168_v26, %v167_v25  ;;  %v169_v31 = vld [vmem:[#allocation8 + $0x40] sm:$0xff]  ;;  %v170_v32 = vld [vmem:[#allocation8 + $0x48] sm:$0xff] }
  0x3e   :  { %391 = vmatpush3.bf16.msra.mxu0 %v390_v7  ;;  %v402_v33 = vpack.c.bf16 %v77_v29, %v76_v28  ;;  %v78_v34 = vld [vmem:[#allocation6 + $0x60] sm:$0xff]  ;;  %v79_v35 = vld [vmem:[#allocation6 + $0x68] sm:$0xff]  ;;  %v423_v36 = vpack.c.bf16 %v170_v32, %v169_v31  ;;  %v80_v38 = vld [vmem:[#allocation6 + $0x70] sm:$0xff] }
  0x3f   :  { %392 = vmatprep.subr.bf16.mxu0 %v546_v0  ;;  %v405_v37 = vpack.c.bf16 %v79_v35, %v78_v34  ;;  %v81_v39 = vld [vmem:[#allocation6 + $0x78] sm:$0xff]  ;;  %v171_v42 = vld [vmem:[#allocation8 + $0x50] sm:$0xff]  ;;  %v173_v45 = vld [vmem:[#allocation8 + $0x60] sm:$0xff] }
  0x40   :  { %415 = vmatpush3.bf16.msra.mxu1 %v414_v18  ;;  %v408_v40 = vpack.c.bf16 %v81_v39, %v80_v38  ;;  %v65_v41 = vld [vmem:[#allocation3] sm:$0xff]  ;;  %v174_v46 = vld [vmem:[#allocation8 + $0x68] sm:$0xff]  ;;  %v175_v48 = vld [vmem:[#allocation8 + $0x70] sm:$0xff] }
  0x41   :  { %416 = vmatprep.subr.bf16.mxu1 %v546_v0  ;;  %v172_v43 = vld [vmem:[#allocation8 + $0x58] sm:$0xff]  ;;  %v429_v47 = vpack.c.bf16 %v174_v46, %v173_v45 }
  0x42   :  { %394 = vmatpush3.bf16.msra.mxu0 %v393_v14  ;;  %v426_v44 = vpack.c.bf16 %v172_v43, %v171_v42  ;;  %v176_v49 = vld [vmem:[#allocation8 + $0x78] sm:$0xff] }
  0x43   :  { %395 = vmatprep.subr.bf16.mxu0 %v546_v0  ;;  %v432_v50 = vpack.c.bf16 %v176_v49, %v175_v48  ;;  %v280_v51 = vld [vmem:[%s658_s2] ss:$0 sm:$0xff]  ;;  %s513_s2 = scalar_lea.vmem %s271_s8, 128 }
  0x44   :  { %418 = vmatpush3.bf16.msra.mxu1 %v417_v24  ;;  %v281_v56 = vld [vmem:[%s660_s4] ss:$0 sm:$0xff]  ;;  %p514_p10 = scmp.ne.s32.totalorder %s271_s8, %s513_s2  ;;  %p519_p12 = scmp.lt.s32.totalorder %s513_s2, %s513_s2 }
  0x45   :  { %419 = vmatprep.subr.bf16.mxu1 %v546_v0 }
  0x46   :  { %397 = vmatpush3.bf16.msra.mxu0 %v396_v21  ;;  %p520_p13 = por %p519_p12, %p518_p11 }
  0x47   :  { %398 = vmatprep.subr.bf16.mxu0 %v546_v0 }
  0x48   :  { %421 = vmatpush3.bf16.msra.mxu1 %v420_v30  ;;  %p521_p0 = pnand %p520_p13, %p514_p10 }
  0x49   :  { %422 = vmatprep.subr.bf16.mxu1 %v546_v0 }
  0x4a   :  { %400 = vmatpush3.bf16.msra.mxu0 %v399_v27 }
  0x4b   :  { %401 = vmatprep.subr.bf16.mxu0 %v546_v0 }
  0x4c   :  { %424 = vmatpush3.bf16.msra.mxu1 %v423_v36 }
  0x4d   :  { %425 = vmatprep.subr.bf16.mxu1 %v546_v0 }
  0x4e   :  { %403 = vmatpush3.bf16.msra.mxu0 %v402_v33 }
  0x4f   :  { %404 = vmatprep.subr.bf16.mxu0 %v546_v0 }
  0x50   :  { %427 = vmatpush3.bf16.msra.mxu1 %v426_v44 }
  0x51   :  { %428 = vmatprep.subr.bf16.mxu1 %v546_v0 }
  0x52   :  { %406 = vmatpush3.bf16.msra.mxu0 %v405_v37 }
  0x53   :  { %407 = vmatprep.subr.bf16.mxu0 %v546_v0 }
  0x54   :  { %430 = vmatpush3.bf16.msra.mxu1 %v429_v47 }
  0x55   :  { %431 = vmatprep.subr.bf16.mxu1 %v546_v0 }
  0x56   :  { %409 = vmatpush3.bf16.msra.mxu0 %v408_v40 }
  0x58   :  { %433 = vmatpush3.bf16.msra.mxu1 %v432_v50 }
  0x59   :  { %349 = vmatmul.mubr.f32.vlgmr.msra.gmra.mrb[0].mxu0 %v65_v41 }
 0x12c   :  { %v155_v52 = vpop.f32.mrb[0].mxu0 }
 0x12d   :  { %v156_v53 = vadd.f32 %v280_v51, %v155_v52  ;;  %v350_v54 = vpop.f32.mrb[1].mxu0 }
 0x12f   :  { %443 = vtanh.f32 %v156_v53 }
 0x139   :  { %v444_v55 = vpop.eup %443 }
 0x13a   :  { %384 = vmatmul.mubr.f32.vlgmr.msra.gmra.mrb[0].mxu1 %v444_v55 }
 0x20d   :  { %v243_v57 = vpop.f32.mrb[0].mxu1 }
 0x20e   :  { %v260_v58 = vadd.f32 %v281_v56, %v243_v57  ;;  %v385_v59 = vpop.f32.mrb[1].mxu1 }
 0x210   :  { %v261_v60 = vadd.f32 %v260_v58, %v65_v41 }
 0x212   :  { %445 = vtanh.f32 %v261_v60 }
 0x21c   :  { %v446_v61 = vpop.eup %445 }
 0x21d   :  { %263 = vst [vmem:[#allocation9] sm:$0xff] %v446_v61 }
 0x21e   :  { %524 = shalt.err (!%p521_p0)
}
 0x21f   :  { %s525_s4 = scalar_lea.hbm %s661_s5, 128 }
 0x220   :  { %p526_p1 = scmp.ne.s32.totalorder %s661_s5, %s525_s4  ;;  %p529_p2 = scmp.lt.u32.totalorder %s525_s4, %s661_s5 }
 0x222   :  { %p531_p3 = pnand %p529_p2, %p526_p1 }
 0x224   :  { %534 = shalt.err (!%p531_p3)
}
 0x225   :  { %273 = dma.vmem_to_hbm [thread:$0]  %s271_s8, 128, %s661_s5, [#allocation5]  }
 0x226   :  { %539 = dma.done.wait [#allocation5], 128  }
 0x227   :  { %540 = vsyncadd [#allocation5], 4294967168 }
 0x228   :  { %277 = vsyncpa [#allocation4], 1 }
 0x229   :  { %278 = vsyncpa [#allocation7], 1 }
 0x22a   :  { %279 = vsyncpa [#allocation5], 1 }

</bundles_post_ra>
